<compile_context>
chip_gen: v6e
topology: v6e:2x2x1
jax: 0.10.0
libtpu: 0.0.40
codegen_flags: <defaults>
</compile_context>

<pallas_src>
import math

import jax
import jax.numpy as jnp
from jax.experimental import pallas as pl
from jax.experimental.pallas import tpu as pltpu


def _round_up(x, m):
    return (x + m - 1) // m * m


# ---- in-kernel exact GELU -----------------------------------------------------
def _erf(z):
    # Abramowitz & Stegun 7.1.26 rational approximation (|err| < 1.5e-7).
    a1, a2, a3, a4, a5 = (0.254829592, -0.284496736, 1.421413741,
                          -1.453152027, 1.061405429)
    p = 0.3275911
    az = jnp.abs(z)
    # Reciprocal on the EUP (approx) frees the VALU slot; exp is EUP already.
    t = pl.reciprocal(1.0 + p * az, approx=True)
    poly = t * (a1 + t * (a2 + t * (a3 + t * (a4 + t * a5))))
    y = 1.0 - poly * jnp.exp(-az * az)
    return jnp.where(z < 0, -y, y)


def _gelu_exact(x):
    # torch.nn.functional.gelu default (approximate='none'):
    #   0.5 * x * (1 + erf(x / sqrt(2)))
    return 0.5 * x * (1.0 + _erf(x * (1.0 / math.sqrt(2.0))))


# ---- kernel -------------------------------------------------------------------
def mlp_kernel(x_ref, w1_ref, b1_ref, w2_ref, b2_ref, o_ref, acc_ref):
    k = pl.program_id(1)

    @pl.when(k == 0)
    def _():
        acc_ref[...] = jnp.zeros_like(acc_ref)

    # fc1: bf16 operands on the MXU, f32 accumulation.
    x = x_ref[...].astype(jnp.bfloat16)                               # (TM, H)
    h = jnp.dot(x, w1_ref[...], preferred_element_type=jnp.float32)   # (TM, TK) f32
    h = h + b1_ref[...]
    h = _gelu_exact(h)                                                # GELU in f32
    # dropout: identity in eval mode.
    # TODO(synk): training-mode dropout (pltpu.prng_seed/prng_random_bits) not implemented.

    # fc2 partial product for this mlp_dim slice, accumulated in f32 scratch.
    acc_ref[...] += jnp.dot(h.astype(jnp.bfloat16), w2_ref[...],
                            preferred_element_type=jnp.float32)       # (TM, H)

    @pl.when(k == pl.num_programs(1) - 1)
    def _():
        o_ref[...] = (acc_ref[...] + b2_ref[...]).astype(o_ref.dtype)


# ---- wrapper ------------------------------------------------------------------
def _pick_tk(mlp_dim, max_tk=512):
    """Largest divisor of mlp_dim that is a multiple of 128 and <= max_tk."""
    if mlp_dim <= max_tk or mlp_dim % 128 != 0:
        return mlp_dim                      # keep resident (single K step)
    best = 128
    tk = 128
    while tk <= max_tk:
        if mlp_dim % tk == 0:
            best = tk
        tk += 128
    return best


def _build_call(n, hidden, mlp_dim, tm, tk, out_dtype, single_buffer):
    k_steps = mlp_dim // tk
    grid = (pl.cdiv(n, tm), k_steps)

    def w_spec(shape, index_map):
        if single_buffer:
            return pl.BlockSpec(shape, index_map, pipeline_mode=pl.Buffered(1))
        return pl.BlockSpec(shape, index_map)

    # Explicit VMEM budget (bytes), with headroom; clamp to fit every generation.
    wbufs = 1 if single_buffer else 2
    needed = (
        (hidden * tk + tk * hidden) * 2 * wbufs      # bf16 weight slices
        + (tk + hidden) * 4 * 2                      # bias slices
        + tm * hidden * 4 * 2                        # x blocks (double-buffered)
        + tm * hidden * 4 * 2                        # out blocks
        + tm * tk * 4 * 2                            # h intermediate live values
        + tm * hidden * 4                            # f32 accumulator scratch
    )
    vmem_limit = int(min(max(2 * needed, 32 << 20), 64 << 20))

    cost = pl.CostEstimate(
        flops=4 * n * hidden * mlp_dim,              # two matmuls
        transcendentals=n * mlp_dim,                 # exp inside GELU
        bytes_accessed=(n * hidden * 4               # x
                        + 2 * hidden * mlp_dim * 2   # bf16 weights
                        + (mlp_dim + hidden) * 4     # biases
                        + n * hidden * 4),           # out
    )

    return pl.pallas_call(
        mlp_kernel,
        out_shape=jax.ShapeDtypeStruct((n, hidden), out_dtype),
        grid_spec=pltpu.PrefetchScalarGridSpec(
            num_scalar_prefetch=0,
            grid=grid,
            in_specs=[
                pl.BlockSpec((tm, hidden), lambda i, k: (i, 0)),   # x (resident over k)
                w_spec((hidden, tk), lambda i, k: (0, k)),         # fc1 W^T slice (bf16)
                w_spec((1, tk), lambda i, k: (0, k)),              # fc1 bias slice
                w_spec((tk, hidden), lambda i, k: (k, 0)),         # fc2 W^T slice (bf16)
                w_spec((1, hidden), lambda i, k: (0, 0)),          # fc2 bias
            ],
            out_specs=pl.BlockSpec((tm, hidden), lambda i, k: (i, 0)),
            scratch_shapes=[pltpu.VMEM((tm, hidden), jnp.float32)],
        ),
        compiler_params=pltpu.CompilerParams(
            dimension_semantics=("parallel", "arbitrary"),
            vmem_limit_bytes=vmem_limit,
        ),
        cost_estimate=cost,
    )


def mlp_forward(x, params, *, block_tokens=256):
    """x: (..., hidden). params: w1_t (H, M) bf16, b1 (1, M) f32, w2_t (M, H) bf16, b2 (1, H) f32."""
    w1_t, b1, w2_t, b2 = params["w1_t"], params["b1"], params["w2_t"], params["b2"]
    hidden = x.shape[-1]
    mlp_dim = w1_t.shape[1]
    lead_shape = x.shape[:-1]

    x2 = x.reshape(-1, hidden)
    n = x2.shape[0]

    # Token tile: sublane-aligned, and capped so the token grid has >= 2 steps
    # when possible (both v7x TensorCores get work on small batches).  No
    # jnp.pad: Pallas masks the ragged last block (garbage rows never written).
    tm = min(block_tokens, max(8, _round_up(pl.cdiv(n, 2), 8)))
    tk = _pick_tk(mlp_dim)
    k_steps = mlp_dim // tk

    args = (x2, w1_t, b1, w2_t, b2)
    try:
        out = _build_call(n, hidden, mlp_dim, tm, tk, x.dtype,
                          single_buffer=(k_steps == 1))(*args)
    except Exception:
        # Fall back to default double-buffering if pl.Buffered(1) is rejected.
        out = _build_call(n, hidden, mlp_dim, tm, tk, x.dtype,
                          single_buffer=False)(*args)

    return out.reshape(*lead_shape, hidden)


# ---- pure-JAX reference (PyTorch eval-mode semantics) --------------------------
def reference_forward(x, params):
    w1 = params["w1_t"].astype(jnp.float32)
    w2 = params["w2_t"].astype(jnp.float32)
    h = x @ w1 + params["b1"]
    h = jax.nn.gelu(h, approximate=False)        # exact erf GELU (torch default)
    return h @ w2 + params["b2"]


def init_params(key, hidden, mlp_dim):
    k1, k2, k3, k4 = jax.random.split(key, 4)
    # Mirror Mlp._init_weights: xavier-uniform weights, std=1e-6 normal biases.
    # Weights stored pre-transposed as (in, out) = W^T and in bf16 (MXU-native).
    lim1 = math.sqrt(6.0 / (hidden + mlp_dim))
    w1_t = jax.random.uniform(k1, (hidden, mlp_dim), jnp.float32, -lim1, lim1)
    b1 = 1e-6 * jax.random.normal(k2, (1, mlp_dim), jnp.float32)
    lim2 = math.sqrt(6.0 / (mlp_dim + hidden))
    w2_t = jax.random.uniform(k3, (mlp_dim, hidden), jnp.float32, -lim2, lim2)
    b2 = 1e-6 * jax.random.normal(k4, (1, hidden), jnp.float32)
    return dict(w1_t=w1_t.astype(jnp.bfloat16), b1=b1,
                w2_t=w2_t.astype(jnp.bfloat16), b2=b2)


if __name__ == "__main__":
    # NOTE: hidden=32 is lane-sparse (wastes 3/4 of the 128-wide lanes); tune
    # perf with hidden/mlp_dim that are multiples of 128 (256 on v6e/v7x).
    HIDDEN = 32      # config.hidden_size
    MLP_DIM = 128    # config.transformer['mlp_dim'] (4x hidden)
    B, S = 2, 8      # batch, sequence

    key = jax.random.PRNGKey(0)
    kx, kp = jax.random.split(key)
    x = jax.random.normal(kx, (B, S, HIDDEN), jnp.float32)
    params = init_params(kp, HIDDEN, MLP_DIM)

    out = jax.block_until_ready(mlp_forward(x, params))
    ref = reference_forward(x, params)

    assert out.shape == (B, S, HIDDEN)
    # bf16 MXU operands (f32 accumulation) dominate the deviation from the
    # full-f32 reference; tolerance sized accordingly.
    assert jnp.allclose(out, ref, atol=5e-2, rtol=5e-2), \
        float(jnp.max(jnp.abs(out - ref)))

    print("KERNEL_OK")
</pallas_src>

<mosaic_0001>
module attributes {stable_mosaic.version = 11 : i64} {
  func.func @mlp_kernel(%arg0: i32, %arg1: i32, %arg2: memref<8x32xf32, #tpu.memory_space<vmem>>, %arg3: memref<32x128xbf16, #tpu.memory_space<vmem>>, %arg4: memref<1x128xf32, #tpu.memory_space<vmem>>, %arg5: memref<128x32xbf16, #tpu.memory_space<vmem>>, %arg6: memref<1x32xf32, #tpu.memory_space<vmem>>, %arg7: memref<8x32xf32, #tpu.memory_space<vmem>>, %arg8: memref<8x32xf32, #tpu.memory_space<vmem>>) attributes {dimension_semantics = [#tpu.dimension_semantics<parallel>, #tpu.dimension_semantics<arbitrary>], iteration_bounds = array<i64: 2, 1>, scalar_prefetch = 0 : i64, scratch_operands = 1 : i64, tpu.core_type = #tpu.core_type<tc>, window_params = [{transform_indices = @transform_0, window_bounds = array<i64: 8, 32>}, {pipeline_mode = #tpu.pipeline_mode<synchronous>, transform_indices = @transform_1, window_bounds = array<i64: 32, 128>}, {pipeline_mode = #tpu.pipeline_mode<synchronous>, transform_indices = @transform_2, window_bounds = array<i64: 1, 128>}, {pipeline_mode = #tpu.pipeline_mode<synchronous>, transform_indices = @transform_3, window_bounds = array<i64: 128, 32>}, {pipeline_mode = #tpu.pipeline_mode<synchronous>, transform_indices = @transform_4, window_bounds = array<i64: 1, 32>}, {transform_indices = @transform_5, window_bounds = array<i64: 8, 32>}]} {
    %c0_i32 = arith.constant 0 : i32
    %0 = arith.cmpi eq, %arg1, %c0_i32 : i32
    %1 = arith.extui %0 : i1 to i32
    %c0_i32_0 = arith.constant 0 : i32
    %2 = arith.cmpi ne, %1, %c0_i32_0 : i32
    scf.if %2 {
      %cst_29 = arith.constant 0.000000e+00 : f32
      %58 = vector.broadcast %cst_29 : f32 to vector<8x32xf32>
      %c0_30 = arith.constant 0 : index
      %c0_31 = arith.constant 0 : index
      %59 = vector.load %arg8[%c0_30, %c0_31] : memref<8x32xf32, #tpu.memory_space<vmem>>, vector<8x32xf32>
      tpu.vector_store %arg8[%c0_30, %c0_31], %58 {strides = array<i32>} : memref<8x32xf32, #tpu.memory_space<vmem>>, vector<8x32xf32>,
    } else {
    }
    %c0 = arith.constant 0 : index
    %c0_1 = arith.constant 0 : index
    %3 = vector.load %arg2[%c0, %c0_1] : memref<8x32xf32, #tpu.memory_space<vmem>>, vector<8x32xf32>
    %4 = arith.truncf %3 : vector<8x32xf32> to vector<8x32xbf16>
    %c0_2 = arith.constant 0 : index
    %c0_3 = arith.constant 0 : index
    %5 = vector.load %arg3[%c0_2, %c0_3] : memref<32x128xbf16, #tpu.memory_space<vmem>>, vector<32x128xbf16>
    %cst = arith.constant dense<0.000000e+00> : vector<8x128xf32>
    %6 = tpu.matmul %4, %5, %cst {dimension_numbers = #tpu.dot_dimension_numbers<[1], [0], [0], [1], [0, 0, 1, 1], [], []>} : vector<8x32xbf16>, vector<32x128xbf16>, vector<8x128xf32> -> vector<8x128xf32>
    %c0_4 = arith.constant 0 : index
    %c0_5 = arith.constant 0 : index
    %7 = vector.load %arg4[%c0_4, %c0_5] : memref<1x128xf32, #tpu.memory_space<vmem>>, vector<1x128xf32>
    %8 = vector.broadcast %7 : vector<1x128xf32> to vector<8x128xf32>
    %9 = arith.addf %6, %8 : vector<8x128xf32>
    %cst_6 = arith.constant 5.000000e-01 : f32
    %10 = vector.broadcast %cst_6 : f32 to vector<8x128xf32>
    %11 = arith.mulf %10, %9 : vector<8x128xf32>
    %cst_7 = arith.constant 0.707106769 : f32
    %12 = vector.broadcast %cst_7 : f32 to vector<8x128xf32>
    %13 = arith.mulf %9, %12 : vector<8x128xf32>
    %14 = math.absf %13 : vector<8x128xf32>
    %cst_8 = arith.constant 0.327591091 : f32
    %15 = vector.broadcast %cst_8 : f32 to vector<8x128xf32>
    %16 = arith.mulf %15, %14 : vector<8x128xf32>
    %cst_9 = arith.constant 1.000000e+00 : f32
    %17 = vector.broadcast %cst_9 : f32 to vector<8x128xf32>
    %18 = arith.addf %17, %16 : vector<8x128xf32>
    %19 = tpu.reciprocal %18 {approx = true} : vector<8x128xf32> -> vector<8x128xf32>
    %cst_10 = arith.constant 1.06140542 : f32
    %20 = vector.broadcast %cst_10 : f32 to vector<8x128xf32>
    %21 = arith.mulf %19, %20 : vector<8x128xf32>
    %cst_11 = arith.constant -1.45315206 : f32
    %22 = vector.broadcast %cst_11 : f32 to vector<8x128xf32>
    %23 = arith.addf %22, %21 : vector<8x128xf32>
    %24 = arith.mulf %19, %23 : vector<8x128xf32>
    %cst_12 = arith.constant 1.42141378 : f32
    %25 = vector.broadcast %cst_12 : f32 to vector<8x128xf32>
    %26 = arith.addf %25, %24 : vector<8x128xf32>
    %27 = arith.mulf %19, %26 : vector<8x128xf32>
    %cst_13 = arith.constant -0.284496725 : f32
    %28 = vector.broadcast %cst_13 : f32 to vector<8x128xf32>
    %29 = arith.addf %28, %27 : vector<8x128xf32>
    %30 = arith.mulf %19, %29 : vector<8x128xf32>
    %cst_14 = arith.constant 0.254829586 : f32
    %31 = vector.broadcast %cst_14 : f32 to vector<8x128xf32>
    %32 = arith.addf %31, %30 : vector<8x128xf32>
    %33 = arith.mulf %19, %32 : vector<8x128xf32>
    %cst_15 = arith.constant 0.000000e+00 : f32
    %34 = vector.broadcast %cst_15 : f32 to vector<8x128xf32>
    %35 = arith.subf %34, %14 : vector<8x128xf32>
    %36 = arith.mulf %35, %14 : vector<8x128xf32>
    %37 = math.exp %36 : vector<8x128xf32>
    %38 = arith.mulf %33, %37 : vector<8x128xf32>
    %cst_16 = arith.constant 1.000000e+00 : f32
    %39 = vector.broadcast %cst_16 : f32 to vector<8x128xf32>
    %40 = arith.subf %39, %38 : vector<8x128xf32>
    %cst_17 = arith.constant 0.000000e+00 : f32
    %41 = vector.broadcast %cst_17 : f32 to vector<8x128xf32>
    %42 = arith.cmpf olt, %13, %41 : vector<8x128xf32>
    %cst_18 = arith.constant 0.000000e+00 : f32
    %43 = vector.broadcast %cst_18 : f32 to vector<8x128xf32>
    %44 = arith.subf %43, %40 : vector<8x128xf32>
    %45 = arith.select %42, %44, %40 : vector<8x128xi1>, vector<8x128xf32>
    %cst_19 = arith.constant 1.000000e+00 : f32
    %46 = vector.broadcast %cst_19 : f32 to vector<8x128xf32>
    %47 = arith.addf %46, %45 : vector<8x128xf32>
    %48 = arith.mulf %11, %47 : vector<8x128xf32>
    %c0_20 = arith.constant 0 : index
    %c0_21 = arith.constant 0 : index
    %49 = vector.load %arg8[%c0_20, %c0_21] : memref<8x32xf32, #tpu.memory_space<vmem>>, vector<8x32xf32>
    %50 = arith.truncf %48 : vector<8x128xf32> to vector<8x128xbf16>
    %c0_22 = arith.constant 0 : index
    %c0_23 = arith.constant 0 : index
    %51 = vector.load %arg5[%c0_22, %c0_23] : memref<128x32xbf16, #tpu.memory_space<vmem>>, vector<128x32xbf16>
    %cst_24 = arith.constant dense<0.000000e+00> : vector<8x32xf32>
    %52 = tpu.matmul %50, %51, %cst_24 {dimension_numbers = #tpu.dot_dimension_numbers<[1], [0], [0], [1], [0, 0, 1, 1], [], []>} : vector<8x128xbf16>, vector<128x32xbf16>, vector<8x32xf32> -> vector<8x32xf32>
    %53 = arith.addf %49, %52 : vector<8x32xf32>
    %c0_25 = arith.constant 0 : index
    %c0_26 = arith.constant 0 : index
    %54 = vector.load %arg8[%c0_25, %c0_26] : memref<8x32xf32, #tpu.memory_space<vmem>>, vector<8x32xf32>
    tpu.vector_store %arg8[%c0_25, %c0_26], %53 {strides = array<i32>} : memref<8x32xf32, #tpu.memory_space<vmem>>, vector<8x32xf32>,
    %c0_i32_27 = arith.constant 0 : i32
    %55 = arith.cmpi eq, %arg1, %c0_i32_27 : i32
    %56 = arith.extui %55 : i1 to i32
    %c0_i32_28 = arith.constant 0 : i32
    %57 = arith.cmpi ne, %56, %c0_i32_28 : i32
    scf.if %57 {
      %c0_29 = arith.constant 0 : index
      %c0_30 = arith.constant 0 : index
      %58 = vector.load %arg8[%c0_29, %c0_30] : memref<8x32xf32, #tpu.memory_space<vmem>>, vector<8x32xf32>
      %c0_31 = arith.constant 0 : index
      %c0_32 = arith.constant 0 : index
      %59 = vector.load %arg6[%c0_31, %c0_32] : memref<1x32xf32, #tpu.memory_space<vmem>>, vector<1x32xf32>
      %60 = vector.broadcast %59 : vector<1x32xf32> to vector<8x32xf32>
      %61 = arith.addf %58, %60 : vector<8x32xf32>
      %c0_33 = arith.constant 0 : index
      %c0_34 = arith.constant 0 : index
      %62 = vector.load %arg7[%c0_33, %c0_34] : memref<8x32xf32, #tpu.memory_space<vmem>>, vector<8x32xf32>
      tpu.vector_store %arg7[%c0_33, %c0_34], %61 {strides = array<i32>} : memref<8x32xf32, #tpu.memory_space<vmem>>, vector<8x32xf32>,
    } else {
    }
    return
  }
  func.func @transform_0(%arg0: i32, %arg1: i32) -> (i32, i32) {
    %c0_i32 = arith.constant 0 : i32
    %c0_i32_0 = arith.constant 0 : i32
    return %arg0, %c0_i32 : i32, i32
  }
  func.func @transform_1(%arg0: i32, %arg1: i32) -> (i32, i32) {
    %c0_i32 = arith.constant 0 : i32
    %c0_i32_0 = arith.constant 0 : i32
    return %c0_i32, %arg1 : i32, i32
  }
  func.func @transform_2(%arg0: i32, %arg1: i32) -> (i32, i32) {
    %c0_i32 = arith.constant 0 : i32
    %c0_i32_0 = arith.constant 0 : i32
    return %c0_i32, %arg1 : i32, i32
  }
  func.func @transform_3(%arg0: i32, %arg1: i32) -> (i32, i32) {
    %c0_i32 = arith.constant 0 : i32
    %c0_i32_0 = arith.constant 0 : i32
    return %arg1, %c0_i32 : i32, i32
  }
  func.func @transform_4(%arg0: i32, %arg1: i32) -> (i32, i32) {
    %c0_i32 = arith.constant 0 : i32
    %c0_i32_0 = arith.constant 0 : i32
    %c0_i32_1 = arith.constant 0 : i32
    return %c0_i32, %c0_i32_0 : i32, i32
  }
  func.func @transform_5(%arg0: i32, %arg1: i32) -> (i32, i32) {
    %c0_i32 = arith.constant 0 : i32
    %c0_i32_0 = arith.constant 0 : i32
    return %arg0, %c0_i32 : i32, i32
  }
}

module attributes {stable_mosaic.version = 11 : i64} {
  func.func @mlp_kernel(%arg0: i32, %arg1: i32, %arg2: memref<8x32xf32, #tpu.memory_space<vmem>>, %arg3: memref<32x128xbf16, #tpu.memory_space<vmem>>, %arg4: memref<1x128xf32, #tpu.memory_space<vmem>>, %arg5: memref<128x32xbf16, #tpu.memory_space<vmem>>, %arg6: memref<1x32xf32, #tpu.memory_space<vmem>>, %arg7: memref<8x32xf32, #tpu.memory_space<vmem>>, %arg8: memref<8x32xf32, #tpu.memory_space<vmem>>) attributes {dimension_semantics = [#tpu.dimension_semantics<parallel>, #tpu.dimension_semantics<arbitrary>], iteration_bounds = array<i64: 2, 1>, scalar_prefetch = 0 : i64, scratch_operands = 1 : i64, tpu.core_type = #tpu.core_type<tc>, window_params = [{transform_indices = @transform_0, window_bounds = array<i64: 8, 32>}, {transform_indices = @transform_1, window_bounds = array<i64: 32, 128>}, {transform_indices = @transform_2, window_bounds = array<i64: 1, 128>}, {transform_indices = @transform_3, window_bounds = array<i64: 128, 32>}, {pipeline_mode = #tpu.pipeline_mode<synchronous>, transform_indices = @transform_4, window_bounds = array<i64: 1, 32>}, {transform_indices = @transform_5, window_bounds = array<i64: 8, 32>}]} {
    %c0_i32 = arith.constant 0 : i32
    %0 = arith.cmpi eq, %arg1, %c0_i32 : i32
    %1 = arith.extui %0 : i1 to i32
    %c0_i32_0 = arith.constant 0 : i32
    %2 = arith.cmpi ne, %1, %c0_i32_0 : i32
    scf.if %2 {
      %cst_29 = arith.constant 0.000000e+00 : f32
      %58 = vector.broadcast %cst_29 : f32 to vector<8x32xf32>
      %c0_30 = arith.constant 0 : index
      %c0_31 = arith.constant 0 : index
      %59 = vector.load %arg8[%c0_30, %c0_31] : memref<8x32xf32, #tpu.memory_space<vmem>>, vector<8x32xf32>
      tpu.vector_store %arg8[%c0_30, %c0_31], %58 {strides = array<i32>} : memref<8x32xf32, #tpu.memory_space<vmem>>, vector<8x32xf32>,
    } else {
    }
    %c0 = arith.constant 0 : index
    %c0_1 = arith.constant 0 : index
    %3 = vector.load %arg2[%c0, %c0_1] : memref<8x32xf32, #tpu.memory_space<vmem>>, vector<8x32xf32>
    %4 = arith.truncf %3 : vector<8x32xf32> to vector<8x32xbf16>
    %c0_2 = arith.constant 0 : index
    %c0_3 = arith.constant 0 : index
    %5 = vector.load %arg3[%c0_2, %c0_3] : memref<32x128xbf16, #tpu.memory_space<vmem>>, vector<32x128xbf16>
    %cst = arith.constant dense<0.000000e+00> : vector<8x128xf32>
    %6 = tpu.matmul %4, %5, %cst {dimension_numbers = #tpu.dot_dimension_numbers<[1], [0], [0], [1], [0, 0, 1, 1], [], []>} : vector<8x32xbf16>, vector<32x128xbf16>, vector<8x128xf32> -> vector<8x128xf32>
    %c0_4 = arith.constant 0 : index
    %c0_5 = arith.constant 0 : index
    %7 = vector.load %arg4[%c0_4, %c0_5] : memref<1x128xf32, #tpu.memory_space<vmem>>, vector<1x128xf32>
    %8 = vector.broadcast %7 : vector<1x128xf32> to vector<8x128xf32>
    %9 = arith.addf %6, %8 : vector<8x128xf32>
    %cst_6 = arith.constant 5.000000e-01 : f32
    %10 = vector.broadcast %cst_6 : f32 to vector<8x128xf32>
    %11 = arith.mulf %10, %9 : vector<8x128xf32>
    %cst_7 = arith.constant 0.707106769 : f32
    %12 = vector.broadcast %cst_7 : f32 to vector<8x128xf32>
    %13 = arith.mulf %9, %12 : vector<8x128xf32>
    %14 = math.absf %13 : vector<8x128xf32>
    %cst_8 = arith.constant 0.327591091 : f32
    %15 = vector.broadcast %cst_8 : f32 to vector<8x128xf32>
    %16 = arith.mulf %15, %14 : vector<8x128xf32>
    %cst_9 = arith.constant 1.000000e+00 : f32
    %17 = vector.broadcast %cst_9 : f32 to vector<8x128xf32>
    %18 = arith.addf %17, %16 : vector<8x128xf32>
    %19 = tpu.reciprocal %18 {approx = true} : vector<8x128xf32> -> vector<8x128xf32>
    %cst_10 = arith.constant 1.06140542 : f32
    %20 = vector.broadcast %cst_10 : f32 to vector<8x128xf32>
    %21 = arith.mulf %19, %20 : vector<8x128xf32>
    %cst_11 = arith.constant -1.45315206 : f32
    %22 = vector.broadcast %cst_11 : f32 to vector<8x128xf32>
    %23 = arith.addf %22, %21 : vector<8x128xf32>
    %24 = arith.mulf %19, %23 : vector<8x128xf32>
    %cst_12 = arith.constant 1.42141378 : f32
    %25 = vector.broadcast %cst_12 : f32 to vector<8x128xf32>
    %26 = arith.addf %25, %24 : vector<8x128xf32>
    %27 = arith.mulf %19, %26 : vector<8x128xf32>
    %cst_13 = arith.constant -0.284496725 : f32
    %28 = vector.broadcast %cst_13 : f32 to vector<8x128xf32>
    %29 = arith.addf %28, %27 : vector<8x128xf32>
    %30 = arith.mulf %19, %29 : vector<8x128xf32>
    %cst_14 = arith.constant 0.254829586 : f32
    %31 = vector.broadcast %cst_14 : f32 to vector<8x128xf32>
    %32 = arith.addf %31, %30 : vector<8x128xf32>
    %33 = arith.mulf %19, %32 : vector<8x128xf32>
    %cst_15 = arith.constant 0.000000e+00 : f32
    %34 = vector.broadcast %cst_15 : f32 to vector<8x128xf32>
    %35 = arith.subf %34, %14 : vector<8x128xf32>
    %36 = arith.mulf %35, %14 : vector<8x128xf32>
    %37 = math.exp %36 : vector<8x128xf32>
    %38 = arith.mulf %33, %37 : vector<8x128xf32>
    %cst_16 = arith.constant 1.000000e+00 : f32
    %39 = vector.broadcast %cst_16 : f32 to vector<8x128xf32>
    %40 = arith.subf %39, %38 : vector<8x128xf32>
    %cst_17 = arith.constant 0.000000e+00 : f32
    %41 = vector.broadcast %cst_17 : f32 to vector<8x128xf32>
    %42 = arith.cmpf olt, %13, %41 : vector<8x128xf32>
    %cst_18 = arith.constant 0.000000e+00 : f32
    %43 = vector.broadcast %cst_18 : f32 to vector<8x128xf32>
    %44 = arith.subf %43, %40 : vector<8x128xf32>
    %45 = arith.select %42, %44, %40 : vector<8x128xi1>, vector<8x128xf32>
    %cst_19 = arith.constant 1.000000e+00 : f32
    %46 = vector.broadcast %cst_19 : f32 to vector<8x128xf32>
    %47 = arith.addf %46, %45 : vector<8x128xf32>
    %48 = arith.mulf %11, %47 : vector<8x128xf32>
    %c0_20 = arith.constant 0 : index
    %c0_21 = arith.constant 0 : index
    %49 = vector.load %arg8[%c0_20, %c0_21] : memref<8x32xf32, #tpu.memory_space<vmem>>, vector<8x32xf32>
    %50 = arith.truncf %48 : vector<8x128xf32> to vector<8x128xbf16>
    %c0_22 = arith.constant 0 : index
    %c0_23 = arith.constant 0 : index
    %51 = vector.load %arg5[%c0_22, %c0_23] : memref<128x32xbf16, #tpu.memory_space<vmem>>, vector<128x32xbf16>
    %cst_24 = arith.constant dense<0.000000e+00> : vector<8x32xf32>
    %52 = tpu.matmul %50, %51, %cst_24 {dimension_numbers = #tpu.dot_dimension_numbers<[1], [0], [0], [1], [0, 0, 1, 1], [], []>} : vector<8x128xbf16>, vector<128x32xbf16>, vector<8x32xf32> -> vector<8x32xf32>
    %53 = arith.addf %49, %52 : vector<8x32xf32>
    %c0_25 = arith.constant 0 : index
    %c0_26 = arith.constant 0 : index
    %54 = vector.load %arg8[%c0_25, %c0_26] : memref<8x32xf32, #tpu.memory_space<vmem>>, vector<8x32xf32>
    tpu.vector_store %arg8[%c0_25, %c0_26], %53 {strides = array<i32>} : memref<8x32xf32, #tpu.memory_space<vmem>>, vector<8x32xf32>,
    %c0_i32_27 = arith.constant 0 : i32
    %55 = arith.cmpi eq, %arg1, %c0_i32_27 : i32
    %56 = arith.extui %55 : i1 to i32
    %c0_i32_28 = arith.constant 0 : i32
    %57 = arith.cmpi ne, %56, %c0_i32_28 : i32
    scf.if %57 {
      %c0_29 = arith.constant 0 : index
      %c0_30 = arith.constant 0 : index
      %58 = vector.load %arg8[%c0_29, %c0_30] : memref<8x32xf32, #tpu.memory_space<vmem>>, vector<8x32xf32>
      %c0_31 = arith.constant 0 : index
      %c0_32 = arith.constant 0 : index
      %59 = vector.load %arg6[%c0_31, %c0_32] : memref<1x32xf32, #tpu.memory_space<vmem>>, vector<1x32xf32>
      %60 = vector.broadcast %59 : vector<1x32xf32> to vector<8x32xf32>
      %61 = arith.addf %58, %60 : vector<8x32xf32>
      %c0_33 = arith.constant 0 : index
      %c0_34 = arith.constant 0 : index
      %62 = vector.load %arg7[%c0_33, %c0_34] : memref<8x32xf32, #tpu.memory_space<vmem>>, vector<8x32xf32>
      tpu.vector_store %arg7[%c0_33, %c0_34], %61 {strides = array<i32>} : memref<8x32xf32, #tpu.memory_space<vmem>>, vector<8x32xf32>,
    } else {
    }
    return
  }
  func.func @transform_0(%arg0: i32, %arg1: i32) -> (i32, i32) {
    %c0_i32 = arith.constant 0 : i32
    %c0_i32_0 = arith.constant 0 : i32
    return %arg0, %c0_i32 : i32, i32
  }
  func.func @transform_1(%arg0: i32, %arg1: i32) -> (i32, i32) {
    %c0_i32 = arith.constant 0 : i32
    %c0_i32_0 = arith.constant 0 : i32
    return %c0_i32, %arg1 : i32, i32
  }
  func.func @transform_2(%arg0: i32, %arg1: i32) -> (i32, i32) {
    %c0_i32 = arith.constant 0 : i32
    %c0_i32_0 = arith.constant 0 : i32
    return %c0_i32, %arg1 : i32, i32
  }
  func.func @transform_3(%arg0: i32, %arg1: i32) -> (i32, i32) {
    %c0_i32 = arith.constant 0 : i32
    %c0_i32_0 = arith.constant 0 : i32
    return %arg1, %c0_i32 : i32, i32
  }
  func.func @transform_4(%arg0: i32, %arg1: i32) -> (i32, i32) {
    %c0_i32 = arith.constant 0 : i32
    %c0_i32_0 = arith.constant 0 : i32
    %c0_i32_1 = arith.constant 0 : i32
    return %c0_i32, %c0_i32_0 : i32, i32
  }
  func.func @transform_5(%arg0: i32, %arg1: i32) -> (i32, i32) {
    %c0_i32 = arith.constant 0 : i32
    %c0_i32_0 = arith.constant 0 : i32
    return %arg0, %c0_i32 : i32, i32
  }
}

</mosaic_0001>

<bundles_post_ra>
// kernel: tpu_custom_call.1
= control target key start
LH: loop header
LB: loop body
LE: loop exit
PB: predicated region body
PF: predicated region fallthrough
CT: control target
= control target key end

     0   :  { %10 = vsyncpa [#allocation4], 0  ;;  %s1019_s0 = inlined_call_operand.vmem [shape: f32[16,32], index: 0, kind: input, shape index: {}]   ;;  %s1020_s1 = inlined_call_operand.vmem [shape: bf16[32,128], index: 1, kind: input, shape index: {}]   ;;  %s1021_s2 = inlined_call_operand.vmem [shape: f32[1,128], index: 2, kind: input, shape index: {}]   ;;  %s1022_s3 = inlined_call_operand.vmem [shape: bf16[128,32], index: 3, kind: input, shape index: {}]   ;;  %s1023_s4 = inlined_call_operand.vmem [shape: f32[1,32], index: 4, kind: input, shape index: {}]   ;;  %s1024_s5 = inlined_call_operand.hbm [shape: f32[16,32], index: 5, kind: output, shape index: {}]  }
   0x1   :  { %12 = vsyncpa [#allocation4 + $0x1], 0  ;;  %s880_s18 = smov 0   ;;  %s882_s19 = smov 0  }
   0x2   :  { %s884_s20 = smov 0   ;;  %s886_s21 = smov 0  }
   0x3   :  { %s888_s22 = smov 0   ;;  %s890_s23 = smov 0  }
   0x4 LB: > { %s631_s24 = sadd.s32 4294967295, %s845_s23   ;;  %s632_s25 = sadd.s32 4294967294, %s845_s23   ;;  %s845_s23 = sphi %s890_s23, %s18_s23   ;;  %s841_s22 = sphi %s888_s22, %s1031_s22   ;;  %s837_s21 = sphi %s886_s21, %s1030_s21   ;;  %s833_s20 = sphi %s884_s20, %s1029_s20   ;;  %s829_s19 = sphi %s882_s19, %s1028_s19   ;;  %s825_s18 = sphi %s880_s18, %s1027_s18  }
   0x5   : > { %s30_s26 = sadd.s32 1, %s841_s22  ;;  %s162_s27 = sadd.s32 1, %s833_s20 }
   0x6   : > { %p32_p0 = scmp.ge.s32.totalorder %s30_s26, 2  ;;  %p172_p1 = scmp.ne.s32.totalorder %s833_s20, %s829_s19 }
   0x7   : > { %p173_p2 = scmp.eq.s32.totalorder %s631_s24, 1  ;;  %p178_p3 = scmp.ne.s32.totalorder %s829_s19, %s825_s18 }
   0x8   : > { %s1033_s26 = smov (%p32_p0, %s30_s26), 0  ;;  %p179_p5 = scmp.eq.s32.totalorder %s632_s25, 1 }
   0x9   : > { %p920_p4 = por %p173_p2, %p172_p1  ;;  %s159_s29 = ssub.s32 %s841_s22, %s1033_s26 }
   0xa   : > { %p638_p6 = scmp.ge.s32.totalorder %s845_s23, 1  ;;  %p160_p7 = scmp.eq.s32.totalorder %s159_s29, 0 }
   0xb   : > { %p927_p8 = por %p179_p5, %p178_p3  ;;  %p229_p9 = scmp.lt.s32.totalorder %s845_s23, 3 }
   0xc   : > { %s933_s6 = scalar_select %p160_p7, %s833_s20, %s162_s27  }
   0xd   : > { %p230_p10 = pnand %p638_p6, %p229_p9 }
   0xe   : > { %p268_p11 = scmp.lt.s32.totalorder (!%p230_p10), %s837_s21, 1  ;;  %s265_s25 = sand.u32 (!%p230_p10), 1, %s829_s19  }
   0xf   : > { %233 = sbr.rel (%p230_p10) target bundleno = 495 (0x1ef), region = 40  ;;  %s639_s27 = sshll.u32 (!%p230_p10), %s265_s25, 3 }
  0x10   : > { %s655_s8 = sshll.u32 (!%p230_p10), %s837_s21, 7  ;;  %s267_s9 = scalar_lea.vmem (!%p230_p10), [#allocation3], %s639_s27 }
  0x11   : > { %s522_s10 = sshll.u32 (!%p230_p10), %s267_s9, 4  ;;  %s520_s13 = scalar_lea.hbm (!%p230_p10), %s1024_s5, %s655_s8  ;;  %s523_s10 = int_to_ptr.vmem [resolvable:$true] %s522_s10 }
  0x12   : > { %s509_s14 = scalar_lea.sflag (!%p230_p10), [#allocation4], %s265_s25  ;;  %s849_s16 = smov (!%p230_p10), [#allocation3]  }
  0x13   : > { %s773_s17 = sshll.u32 (!%p230_p10), %s849_s16, 4  ;;  %s774_s17 = int_to_ptr.vmem [resolvable:$false] %s773_s17 }
  0x14   : > { %v755_v0 = vld [vmem:[%s1020_s1 + $0x8] sm:$0xff]   ;;  %v847_v1 = vmov 0.0   ;;  %v756_v2 = vld [vmem:[%s1020_s1] sm:$0xff]   ;;  %vm848_vm0 = vmmov 0   ;;  %vm290_vm1 = vcmask 261120   ;;  %s269_s11 = scalar_select %p268_p11, %s837_s21, 1 }
  0x15   : > { %670 = vmatprep.subr.bf16.mxu0 %v847_v1  ;;  %678 = vmatprep.subr.bf16.mxu1 %v847_v1  ;;  %291 = vst.msk [vmem:[#allocation2] sm:$0xff] %vm290_vm1, %v847_v1  ;;  %v757_v5 = vld [vmem:[%s1022_s3 + $0x38] sm:$0xff]   ;;  %v758_v6 = vld [vmem:[%s1022_s3 + $0x30] sm:$0xff]   ;;  %v759_v7 = vld [vmem:[%s1022_s3 + $0x28] sm:$0xff]   ;;  %s775_s21 = scalar_lea.vmem %s774_s17, 256  ;;  %p776_p1 = scmp.lt.s32.totalorder %s523_s10, %s774_s17 }
  0x16   : > { %671 = vmatpush3.bf16.msra.mxu0 %v755_v0  ;;  %674 = vmatprep.mubr.msk.bf16.mxu0 %vm848_vm0, %v847_v1  ;;  %s640_s12 = sshll.u32 %s269_s11, 3  ;;  %v760_v8 = vld [vmem:[%s1022_s3 + $0x20] sm:$0xff]   ;;  %v761_v9 = vld [vmem:[%s1022_s3 + $0x18] sm:$0xff]   ;;  %v762_v10 = vld [vmem:[%s1022_s3 + $0x10] sm:$0xff]  }
  0x17   : > { %672 = vmatprep.subr.bf16.mxu0 %v847_v1  ;;  %694 = vmatprep.mubr.msk.bf16.mxu1 %vm848_vm0, %v847_v1  ;;  %s271_s15 = scalar_lea.vmem %s1019_s0, %s640_s12  ;;  %v763_v11 = vld [vmem:[%s1022_s3 + $0x8] sm:$0xff]   ;;  %v764_v12 = vld [vmem:[%s1022_s3] sm:$0xff]  }
  0x18   : > { %v292_v3 = vld [vmem:[%s271_s15] sm:$0xff]  ;;  %679 = vmatpush3.bf16.msra.mxu1 %v757_v5  ;;  %s769_s15 = scalar_lea.vmem %s523_s10, 128 }
  0x19   : > { %v293_v4 = vpack.c.bf16 %v292_v3, %v292_v3  ;;  %680 = vmatprep.subr.bf16.mxu1 %v847_v1  ;;  %v641_v13 = vld [vmem:[%s1021_s2] ss:$0 sm:$0xff]  ;;  %p770_p12 = scmp.ne.s32.totalorder %s523_s10, %s769_s15  ;;  %p777_p2 = scmp.lt.s32.totalorder %s775_s21, %s769_s15 }
  0x1a   : > { %673 = vmatpush3.bf16.msra.mxu0 %v756_v2  ;;  %v653_v51 = vld [vmem:[%s1023_s4] ss:$0 sm:$0xff] }
  0x1b   : > { %p771_p13 = pnand %p770_p12, %p920_p4  ;;  %p778_p3 = por %p777_p2, %p776_p1 }
  0x1c   : > { %681 = vmatpush3.bf16.msra.mxu1 %v758_v6  ;;  %v387_v45 = vld [vmem:[#allocation2] sm:$0xff] }
  0x1d   : > { %675 = vmatmul.mubr.msk.bf16.vlgmr.msra.gmra.mxu0 %vm290_vm1, %v293_v4  ;;  %682 = vmatprep.subr.bf16.mxu1 %v847_v1  ;;  %p772_p0 = pneg %p771_p13 }
  0x1f   : > { %p779_p5 = pnand %p778_p3, %p772_p0 }
  0x20   : > { %683 = vmatpush3.bf16.msra.mxu1 %v759_v7 }
  0x21   : > { %684 = vmatprep.subr.bf16.mxu1 %v847_v1 }
  0x24   : > { %685 = vmatpush3.bf16.msra.mxu1 %v760_v8 }
  0x25   : > { %686 = vmatprep.subr.bf16.mxu1 %v847_v1 }
  0x28   : > { %687 = vmatpush3.bf16.msra.mxu1 %v761_v9 }
  0x29   : > { %688 = vmatprep.subr.bf16.mxu1 %v847_v1 }
  0x2c   : > { %689 = vmatpush3.bf16.msra.mxu1 %v762_v10 }
  0x2d   : > { %690 = vmatprep.subr.bf16.mxu1 %v847_v1 }
  0x30   : > { %691 = vmatpush3.bf16.msra.mxu1 %v763_v11 }
  0x31   : > { %692 = vmatprep.subr.bf16.mxu1 %v847_v1 }
  0x34   : > { %693 = vmatpush3.bf16.msra.mxu1 %v764_v12 }
  0xdd   : > { %v355_v14 = vpop.f32.mrf.mxu0 }
  0xde   : > { %v356_v15 = vadd.f32 %v641_v13, %v355_v14 }
  0xdf   : > { %v676_v16 = vpop.f32.mrf.mxu0 }
  0xe0   : > { %v362_v17 = vmul.f32 0.70710677, %v356_v15  ;;  %v361_v41 = vmul.f32 0.5, %v356_v15 }
  0xe1   : > { %v358_v18 = vpop.f32.mrf.mxu0 }
  0xe2   : > { %v363_v19 = vand.u32 2147483647, %v362_v17  ;;  %vm382_vm2 = vcmp.lt.f32.partialorder %v362_v17, 0.0 }
  0xe3   : > { %v677_v20 = vpop.f32.mrf.mxu0 }
  0xe4   : > { %v364_v21 = vmul.f32 0.3275911, %v363_v19  ;;  %v376_v23 = vsub.f32 0.0, %v363_v19 }
  0xe6   : > { %v365_v22 = vadd.f32 1.0, %v364_v21  ;;  %v377_v24 = vmul.f32 %v376_v23, %v363_v19 }
  0xe8   : > { %765 = vrcp.f32 %v365_v22  ;;  %v378_v26 = vmul.f32 1.442695, %v377_v24 }
  0xea   : > { %767 = vpow2.f32 %v378_v26 }
  0xf5   : > { %v766_v25 = vpop.eup %765 }
  0xf6   : > { %v367_v27 = vmul.f32 1.0614054, %v766_v25 }
  0xf7   : > { %v768_v36 = vpop.eup %767 }
  0xf8   : > { %v368_v28 = vadd.f32 -1.4531521, %v367_v27 }
  0xfa   : > { %v369_v29 = vmul.f32 %v766_v25, %v368_v28 }
  0xfc   : > { %v370_v30 = vadd.f32 1.4214138, %v369_v29 }
  0xfe   : > { %v371_v31 = vmul.f32 %v766_v25, %v370_v30 }
 0x100   : > { %v372_v32 = vadd.f32 -0.28449672, %v371_v31 }
 0x102   : > { %v373_v33 = vmul.f32 %v766_v25, %v372_v32 }
 0x104   : > { %v374_v34 = vadd.f32 0.2548296, %v373_v33 }
 0x106   : > { %v375_v35 = vmul.f32 %v766_v25, %v374_v34 }
 0x108   : > { %v380_v37 = vmul.f32 %v768_v36, %v375_v35 }
 0x10a   : > { %v381_v38 = vsub.f32 1.0, %v380_v37 }
 0x10c   : > { %v383_v39 = vsub.f32 0.0, %v381_v38 }
 0x10e   : > { %v384_v40 = vsel %vm382_vm2, %v383_v39, %v381_v38 }
 0x10f   : > { %v385_v42 = vadd.f32 1.0, %v384_v40 }
 0x111   : > { %v386_v43 = vmul.f32 %v385_v42, %v361_v41 }
 0x113   : > { %v388_v44 = vpack.c.bf16 %v386_v43, %v386_v43 }
 0x115   : > { %695 = vmatmul.mubr.bf16.vlgmr.msra.gmra.mxu1 %v388_v44 }
 0x1d5   : > { %v487_v46 = vpop.f32.mrf.mxu1 }
 0x1d6   : > { %v493_v47 = vadd.f32 %v487_v46, %v387_v45 }
 0x1d7   : > { %v696_v48 = vpop.f32.mrf.mxu1 }
 0x1d8   : > { %494 = vst.msk [vmem:[#allocation2] sm:$0xff] %vm290_vm1, %v493_v47 }
 0x1d9   : > { %v490_v49 = vpop.f32.mrf.mxu1 }
 0x1db   : > { %v697_v50 = vpop.f32.mrf.mxu1 }
 0x1df   : > { %v498_v52 = vld [vmem:[#allocation2] sm:$0xff] }
 0x1e0   : > { %v506_v53 = vadd.f32 %v653_v51, %v498_v52 }
 0x1e2   : > { %507 = vst.msk [vmem:[%s267_s9] sm:$0xff] %vm290_vm1, %v506_v53 }
 0x1e3   : > { %782 = shalt.err (!%p779_p5)
}
 0x1e4   : > { %s783_s24 = scalar_lea.hbm %s520_s13, 128  ;;  %s787_s29 = scalar_lea.hbm %s1024_s5, 256 }
 0x1e5   : > { %p784_p6 = scmp.ne.s32.totalorder %s520_s13, %s783_s24  ;;  %p788_p10 = scmp.lt.s32.totalorder %s520_s13, %s1024_s5 }
 0x1e6   : > { %p789_p11 = scmp.lt.s32.totalorder %s787_s29, %s783_s24 }
 0x1e7   : > { %p785_p7 = pnand %p784_p6, %p920_p4 }
 0x1e8   : > { %p790_p12 = por %p789_p11, %p788_p10 }
 0x1e9   : > { %p786_p9 = pneg %p785_p7 }
 0x1eb   : > { %p791_p13 = pnand %p790_p12, %p786_p9 }
 0x1ed   : > { %794 = shalt.err (!%p791_p13)
}
 0x1ee   : > { %698 = dma.vmem_to_hbm [thread:$0]  (%p920_p4), %s523_s10, 128, %s520_s13, %s509_s14  }
 0x1ef PF: > { %p704_p0 = scmp.ge.s32.totalorder %s845_s23, 2  ;;  %s534_s9 = sand.u32 1, %s825_s18  }
 0x1f0   : > { %s535_s11 = scalar_lea.sflag [#allocation4], %s534_s9 }
 0x1f1   : > { %p701_p1 = pnand %p704_p0, %p927_p8 }
 0x1f3   : > { %p702_p2 = pneg %p701_p1 }
 0x1f5   : > { %820 = dma.done.wait (%p702_p2), %s535_s11, 128  }
 0x1f6   : > { %822 = vsyncadd (%p702_p2), %s535_s11, 4294967168  ;;  %s18_s23 = sadd.s32 1, %s845_s23   ;;  %s1027_s18 = smov %s829_s19 }
 0x1f7   : > { %p15_p3 = scmp.ge.s32.totalorder %s18_s23, 4   ;;  %s1028_s19 = smov %s833_s20 }
 0x1f8   : > { %s1029_s20 = smov %s933_s6  ;;  %s1030_s21 = smov %s841_s22 }
 0x1f9   : > { %s1031_s22 = smov %s1033_s26  ;;  %17 = sbr.rel (!%p15_p3) target bundleno = 4 (0x4), region = 92 }
 0x1fe   :  { %540 = vsyncpa [#allocation4], 1 }
 0x1ff   :  { %542 = vsyncpa [#allocation4 + $0x1], 1 }

// kernel: tpu_custom_call.1
= control target key start
LH: loop header
LB: loop body
LE: loop exit
PB: predicated region body
PF: predicated region fallthrough
CT: control target
= control target key end

     0   :  { %10 = vsyncpa [#allocation4], 0  ;;  %s1019_s0 = inlined_call_operand.vmem [shape: f32[16,32], index: 0, kind: input, shape index: {}]   ;;  %s1020_s1 = inlined_call_operand.vmem [shape: bf16[32,128], index: 1, kind: input, shape index: {}]   ;;  %s1021_s2 = inlined_call_operand.vmem [shape: f32[1,128], index: 2, kind: input, shape index: {}]   ;;  %s1022_s3 = inlined_call_operand.vmem [shape: bf16[128,32], index: 3, kind: input, shape index: {}]   ;;  %s1023_s4 = inlined_call_operand.vmem [shape: f32[1,32], index: 4, kind: input, shape index: {}]   ;;  %s1024_s5 = inlined_call_operand.hbm [shape: f32[16,32], index: 5, kind: output, shape index: {}]  }
   0x1   :  { %12 = vsyncpa [#allocation4 + $0x1], 0  ;;  %s880_s18 = smov 0   ;;  %s882_s19 = smov 0  }
   0x2   :  { %s884_s20 = smov 0   ;;  %s886_s21 = smov 0  }
   0x3   :  { %s888_s22 = smov 0   ;;  %s890_s23 = smov 0  }
   0x4 LB: > { %s631_s24 = sadd.s32 4294967295, %s845_s23   ;;  %s632_s25 = sadd.s32 4294967294, %s845_s23   ;;  %s845_s23 = sphi %s890_s23, %s18_s23   ;;  %s841_s22 = sphi %s888_s22, %s1031_s22   ;;  %s837_s21 = sphi %s886_s21, %s1030_s21   ;;  %s833_s20 = sphi %s884_s20, %s1029_s20   ;;  %s829_s19 = sphi %s882_s19, %s1028_s19   ;;  %s825_s18 = sphi %s880_s18, %s1027_s18  }
   0x5   : > { %s30_s26 = sadd.s32 1, %s841_s22  ;;  %s162_s27 = sadd.s32 1, %s833_s20 }
   0x6   : > { %p32_p0 = scmp.ge.s32.totalorder %s30_s26, 2  ;;  %p172_p1 = scmp.ne.s32.totalorder %s833_s20, %s829_s19 }
   0x7   : > { %p173_p2 = scmp.eq.s32.totalorder %s631_s24, 1  ;;  %p178_p3 = scmp.ne.s32.totalorder %s829_s19, %s825_s18 }
   0x8   : > { %s1033_s26 = smov (%p32_p0, %s30_s26), 0  ;;  %p179_p5 = scmp.eq.s32.totalorder %s632_s25, 1 }
   0x9   : > { %p920_p4 = por %p173_p2, %p172_p1  ;;  %s159_s29 = ssub.s32 %s841_s22, %s1033_s26 }
   0xa   : > { %p638_p6 = scmp.ge.s32.totalorder %s845_s23, 1  ;;  %p160_p7 = scmp.eq.s32.totalorder %s159_s29, 0 }
   0xb   : > { %p927_p8 = por %p179_p5, %p178_p3  ;;  %p229_p9 = scmp.lt.s32.totalorder %s845_s23, 3 }
   0xc   : > { %s933_s6 = scalar_select %p160_p7, %s833_s20, %s162_s27  }
   0xd   : > { %p230_p10 = pnand %p638_p6, %p229_p9 }
   0xe   : > { %p268_p11 = scmp.lt.s32.totalorder (!%p230_p10), %s837_s21, 1  ;;  %s265_s25 = sand.u32 (!%p230_p10), 1, %s829_s19  }
   0xf   : > { %233 = sbr.rel (%p230_p10) target bundleno = 495 (0x1ef), region = 40  ;;  %s639_s27 = sshll.u32 (!%p230_p10), %s265_s25, 3 }
  0x10   : > { %s655_s8 = sshll.u32 (!%p230_p10), %s837_s21, 7  ;;  %s267_s9 = scalar_lea.vmem (!%p230_p10), [#allocation3], %s639_s27 }
  0x11   : > { %s522_s10 = sshll.u32 (!%p230_p10), %s267_s9, 4  ;;  %s520_s13 = scalar_lea.hbm (!%p230_p10), %s1024_s5, %s655_s8  ;;  %s523_s10 = int_to_ptr.vmem [resolvable:$true] %s522_s10 }
  0x12   : > { %s509_s14 = scalar_lea.sflag (!%p230_p10), [#allocation4], %s265_s25  ;;  %s849_s16 = smov (!%p230_p10), [#allocation3]  }
  0x13   : > { %s773_s17 = sshll.u32 (!%p230_p10), %s849_s16, 4  ;;  %s774_s17 = int_to_ptr.vmem [resolvable:$false] %s773_s17 }
  0x14   : > { %v755_v0 = vld [vmem:[%s1020_s1 + $0x8] sm:$0xff]   ;;  %v847_v1 = vmov 0.0   ;;  %v756_v2 = vld [vmem:[%s1020_s1] sm:$0xff]   ;;  %vm848_vm0 = vmmov 0   ;;  %vm290_vm1 = vcmask 261120   ;;  %s269_s11 = scalar_select %p268_p11, %s837_s21, 1 }
  0x15   : > { %670 = vmatprep.subr.bf16.mxu0 %v847_v1  ;;  %678 = vmatprep.subr.bf16.mxu1 %v847_v1  ;;  %291 = vst.msk [vmem:[#allocation2] sm:$0xff] %vm290_vm1, %v847_v1  ;;  %v757_v5 = vld [vmem:[%s1022_s3 + $0x38] sm:$0xff]   ;;  %v758_v6 = vld [vmem:[%s1022_s3 + $0x30] sm:$0xff]   ;;  %v759_v7 = vld [vmem:[%s1022_s3 + $0x28] sm:$0xff]   ;;  %s775_s21 = scalar_lea.vmem %s774_s17, 256  ;;  %p776_p1 = scmp.lt.s32.totalorder %s523_s10, %s774_s17 }
  0x16   : > { %671 = vmatpush3.bf16.msra.mxu0 %v755_v0  ;;  %674 = vmatprep.mubr.msk.bf16.mxu0 %vm848_vm0, %v847_v1  ;;  %s640_s12 = sshll.u32 %s269_s11, 3  ;;  %v760_v8 = vld [vmem:[%s1022_s3 + $0x20] sm:$0xff]   ;;  %v761_v9 = vld [vmem:[%s1022_s3 + $0x18] sm:$0xff]   ;;  %v762_v10 = vld [vmem:[%s1022_s3 + $0x10] sm:$0xff]  }
  0x17   : > { %672 = vmatprep.subr.bf16.mxu0 %v847_v1  ;;  %694 = vmatprep.mubr.msk.bf16.mxu1 %vm848_vm0, %v847_v1  ;;  %s271_s15 = scalar_lea.vmem %s1019_s0, %s640_s12  ;;  %v763_v11 = vld [vmem:[%s1022_s3 + $0x8] sm:$0xff]   ;;  %v764_v12 = vld [vmem:[%s1022_s3] sm:$0xff]  }
  0x18   : > { %v292_v3 = vld [vmem:[%s271_s15] sm:$0xff]  ;;  %679 = vmatpush3.bf16.msra.mxu1 %v757_v5  ;;  %s769_s15 = scalar_lea.vmem %s523_s10, 128 }
  0x19   : > { %v293_v4 = vpack.c.bf16 %v292_v3, %v292_v3  ;;  %680 = vmatprep.subr.bf16.mxu1 %v847_v1  ;;  %v641_v13 = vld [vmem:[%s1021_s2] ss:$0 sm:$0xff]  ;;  %p770_p12 = scmp.ne.s32.totalorder %s523_s10, %s769_s15  ;;  %p777_p2 = scmp.lt.s32.totalorder %s775_s21, %s769_s15 }
  0x1a   : > { %673 = vmatpush3.bf16.msra.mxu0 %v756_v2  ;;  %v653_v51 = vld [vmem:[%s1023_s4] ss:$0 sm:$0xff] }
  0x1b   : > { %p771_p13 = pnand %p770_p12, %p920_p4  ;;  %p778_p3 = por %p777_p2, %p776_p1 }
  0x1c   : > { %681 = vmatpush3.bf16.msra.mxu1 %v758_v6  ;;  %v387_v45 = vld [vmem:[#allocation2] sm:$0xff] }
  0x1d   : > { %675 = vmatmul.mubr.msk.bf16.vlgmr.msra.gmra.mxu0 %vm290_vm1, %v293_v4  ;;  %682 = vmatprep.subr.bf16.mxu1 %v847_v1  ;;  %p772_p0 = pneg %p771_p13 }
  0x1f   : > { %p779_p5 = pnand %p778_p3, %p772_p0 }
  0x20   : > { %683 = vmatpush3.bf16.msra.mxu1 %v759_v7 }
  0x21   : > { %684 = vmatprep.subr.bf16.mxu1 %v847_v1 }
  0x24   : > { %685 = vmatpush3.bf16.msra.mxu1 %v760_v8 }
  0x25   : > { %686 = vmatprep.subr.bf16.mxu1 %v847_v1 }
  0x28   : > { %687 = vmatpush3.bf16.msra.mxu1 %v761_v9 }
  0x29   : > { %688 = vmatprep.subr.bf16.mxu1 %v847_v1 }
  0x2c   : > { %689 = vmatpush3.bf16.msra.mxu1 %v762_v10 }
  0x2d   : > { %690 = vmatprep.subr.bf16.mxu1 %v847_v1 }
  0x30   : > { %691 = vmatpush3.bf16.msra.mxu1 %v763_v11 }
  0x31   : > { %692 = vmatprep.subr.bf16.mxu1 %v847_v1 }
  0x34   : > { %693 = vmatpush3.bf16.msra.mxu1 %v764_v12 }
  0xdd   : > { %v355_v14 = vpop.f32.mrf.mxu0 }
  0xde   : > { %v356_v15 = vadd.f32 %v641_v13, %v355_v14 }
  0xdf   : > { %v676_v16 = vpop.f32.mrf.mxu0 }
  0xe0   : > { %v362_v17 = vmul.f32 0.70710677, %v356_v15  ;;  %v361_v41 = vmul.f32 0.5, %v356_v15 }
  0xe1   : > { %v358_v18 = vpop.f32.mrf.mxu0 }
  0xe2   : > { %v363_v19 = vand.u32 2147483647, %v362_v17  ;;  %vm382_vm2 = vcmp.lt.f32.partialorder %v362_v17, 0.0 }
  0xe3   : > { %v677_v20 = vpop.f32.mrf.mxu0 }
  0xe4   : > { %v364_v21 = vmul.f32 0.3275911, %v363_v19  ;;  %v376_v23 = vsub.f32 0.0, %v363_v19 }
  0xe6   : > { %v365_v22 = vadd.f32 1.0, %v364_v21  ;;  %v377_v24 = vmul.f32 %v376_v23, %v363_v19 }
  0xe8   : > { %765 = vrcp.f32 %v365_v22  ;;  %v378_v26 = vmul.f32 1.442695, %v377_v24 }
  0xea   : > { %767 = vpow2.f32 %v378_v26 }
  0xf5   : > { %v766_v25 = vpop.eup %765 }
  0xf6   : > { %v367_v27 = vmul.f32 1.0614054, %v766_v25 }
  0xf7   : > { %v768_v36 = vpop.eup %767 }
  0xf8   : > { %v368_v28 = vadd.f32 -1.4531521, %v367_v27 }
  0xfa   : > { %v369_v29 = vmul.f32 %v766_v25, %v368_v28 }
  0xfc   : > { %v370_v30 = vadd.f32 1.4214138, %v369_v29 }
  0xfe   : > { %v371_v31 = vmul.f32 %v766_v25, %v370_v30 }
 0x100   : > { %v372_v32 = vadd.f32 -0.28449672, %v371_v31 }
 0x102   : > { %v373_v33 = vmul.f32 %v766_v25, %v372_v32 }
 0x104   : > { %v374_v34 = vadd.f32 0.2548296, %v373_v33 }
 0x106   : > { %v375_v35 = vmul.f32 %v766_v25, %v374_v34 }
 0x108   : > { %v380_v37 = vmul.f32 %v768_v36, %v375_v35 }
 0x10a   : > { %v381_v38 = vsub.f32 1.0, %v380_v37 }
 0x10c   : > { %v383_v39 = vsub.f32 0.0, %v381_v38 }
 0x10e   : > { %v384_v40 = vsel %vm382_vm2, %v383_v39, %v381_v38 }
 0x10f   : > { %v385_v42 = vadd.f32 1.0, %v384_v40 }
 0x111   : > { %v386_v43 = vmul.f32 %v385_v42, %v361_v41 }
 0x113   : > { %v388_v44 = vpack.c.bf16 %v386_v43, %v386_v43 }
 0x115   : > { %695 = vmatmul.mubr.bf16.vlgmr.msra.gmra.mxu1 %v388_v44 }
 0x1d5   : > { %v487_v46 = vpop.f32.mrf.mxu1 }
 0x1d6   : > { %v493_v47 = vadd.f32 %v487_v46, %v387_v45 }
 0x1d7   : > { %v696_v48 = vpop.f32.mrf.mxu1 }
 0x1d8   : > { %494 = vst.msk [vmem:[#allocation2] sm:$0xff] %vm290_vm1, %v493_v47 }
 0x1d9   : > { %v490_v49 = vpop.f32.mrf.mxu1 }
 0x1db   : > { %v697_v50 = vpop.f32.mrf.mxu1 }
 0x1df   : > { %v498_v52 = vld [vmem:[#allocation2] sm:$0xff] }
 0x1e0   : > { %v506_v53 = vadd.f32 %v653_v51, %v498_v52 }
 0x1e2   : > { %507 = vst.msk [vmem:[%s267_s9] sm:$0xff] %vm290_vm1, %v506_v53 }
 0x1e3   : > { %782 = shalt.err (!%p779_p5)
}
 0x1e4   : > { %s783_s24 = scalar_lea.hbm %s520_s13, 128  ;;  %s787_s29 = scalar_lea.hbm %s1024_s5, 256 }
 0x1e5   : > { %p784_p6 = scmp.ne.s32.totalorder %s520_s13, %s783_s24  ;;  %p788_p10 = scmp.lt.s32.totalorder %s520_s13, %s1024_s5 }
 0x1e6   : > { %p789_p11 = scmp.lt.s32.totalorder %s787_s29, %s783_s24 }
 0x1e7   : > { %p785_p7 = pnand %p784_p6, %p920_p4 }
 0x1e8   : > { %p790_p12 = por %p789_p11, %p788_p10 }
 0x1e9   : > { %p786_p9 = pneg %p785_p7 }
 0x1eb   : > { %p791_p13 = pnand %p790_p12, %p786_p9 }
 0x1ed   : > { %794 = shalt.err (!%p791_p13)
}
 0x1ee   : > { %698 = dma.vmem_to_hbm [thread:$0]  (%p920_p4), %s523_s10, 128, %s520_s13, %s509_s14  }
 0x1ef PF: > { %p704_p0 = scmp.ge.s32.totalorder %s845_s23, 2  ;;  %s534_s9 = sand.u32 1, %s825_s18  }
 0x1f0   : > { %s535_s11 = scalar_lea.sflag [#allocation4], %s534_s9 }
 0x1f1   : > { %p701_p1 = pnand %p704_p0, %p927_p8 }
 0x1f3   : > { %p702_p2 = pneg %p701_p1 }
 0x1f5   : > { %820 = dma.done.wait (%p702_p2), %s535_s11, 128  }
 0x1f6   : > { %822 = vsyncadd (%p702_p2), %s535_s11, 4294967168  ;;  %s18_s23 = sadd.s32 1, %s845_s23   ;;  %s1027_s18 = smov %s829_s19 }
 0x1f7   : > { %p15_p3 = scmp.ge.s32.totalorder %s18_s23, 4   ;;  %s1028_s19 = smov %s833_s20 }
 0x1f8   : > { %s1029_s20 = smov %s933_s6  ;;  %s1030_s21 = smov %s841_s22 }
 0x1f9   : > { %s1031_s22 = smov %s1033_s26  ;;  %17 = sbr.rel (!%p15_p3) target bundleno = 4 (0x4), region = 92 }
 0x1fe   :  { %540 = vsyncpa [#allocation4], 1 }
 0x1ff   :  { %542 = vsyncpa [#allocation4 + $0x1], 1 }

</bundles_post_ra>
